<compile_context>
chip_gen: v7x
topology: tpu7x:2x2x1
jax: 0.10.0
libtpu: 0.0.40
codegen_flags: <defaults>
</compile_context>

<pallas_src>
import jax
import jax.numpy as jnp
from jax import lax
from jax.experimental import pallas as pl
from jax.experimental.pallas import tpu as pltpu

NEG_SLOPE = 0.2
NEG_INF = -1e30


def _elu(x):
    return jnp.where(x > 0, x, jnp.exp(x) - 1.0)


def _leaky_relu(x):
    return jnp.where(x >= 0, x, NEG_SLOPE * x)


# --------------- Kernel A: GraphConv + fused per-head GAT projection ---------------
def _proj_kernel(a_w_ref, x_ref, w0_ref, b0_ref, w1_ref, z_ref):
    # a_w_ref: (TM, N) bf16 dst-row tile; x_ref: (N, Din) bf16 resident
    # w0_ref: (Din, Hd) f32; b0_ref: (1, Hd) f32; w1_ref: (Hd, H*F) f32
    # z_ref : (TM, H*F) f32     z = ELU(a_w @ x @ w0 + b0) @ w1_flat
    agg = jnp.dot(a_w_ref[...], x_ref[...], preferred_element_type=jnp.float32)
    h0 = _elu(jnp.dot(agg, w0_ref[...], preferred_element_type=jnp.float32) + b0_ref[...])
    z_ref[...] = jnp.dot(h0, w1_ref[...], preferred_element_type=jnp.float32)


# --------------- Kernel B: per-head edge-softmax attention over dst-row tiles -------
def _attn_kernel(a_w_ref, z_ref, attn_l_ref, attn_r_ref, out_ref):
    tm, _ = a_w_ref.shape
    num_heads, _, f = attn_l_ref.shape
    row0 = pl.multiple_of(pl.program_id(0) * tm, tm)

    # Edge structure from edge weights; hoisted out of the head loop.
    # TODO(synk): zero-weight edges are treated as non-edges here; pass an explicit
    # int8 mask instead if zero/negative edge weights must be supported.
    mask = a_w_ref[...] > 0                                            # (TM, N) bool
    deg = jnp.sum(jnp.where(mask, 1.0, 0.0), axis=-1, keepdims=True)   # (TM, 1)
    has_edge = deg > 0.0                                               # zero-degree guard

    z_dst_all = z_ref[pl.ds(row0, tm), :]                              # (TM, H*F) f32

    outs = []
    for h in range(num_heads):                                         # small static unroll
        col = slice(h * f, (h + 1) * f)
        z_src = z_ref[:, col]                                          # (N, F)  f32
        z_dst = z_dst_all[:, col]                                      # (TM, F) f32
        al = attn_l_ref[h]                                             # (1, F)
        ar = attn_r_ref[h]                                             # (1, F)
        # el[src] as a row, er[dst] as a column (tiny F-contractions).
        el_row = lax.dot_general(al, z_src, (((1,), (1,)), ((), ())),
                                 preferred_element_type=jnp.float32)   # (1, N)
        er_col = lax.dot_general(z_dst, ar, (((1,), (1,)), ((), ())),
                                 preferred_element_type=jnp.float32)   # (TM, 1)
        e = _leaky_relu(er_col + el_row)                               # (TM, N)
        e = jnp.where(mask, e, NEG_INF)
        e = e - jnp.max(e, axis=-1, keepdims=True)
        p = jnp.exp(e)                                # masked entries underflow to exactly 0
        denom = jnp.sum(p, axis=-1, keepdims=True)                     # (TM, 1)
        scale = jnp.where(has_edge, pl.reciprocal(denom, approx=True), 0.0)
        # Unnormalized aggregation on the MXU (bf16 operands, f32 accumulate),
        # then scale the small (TM, F) result instead of the (TM, N) alpha matrix.
        s = jnp.dot(p.astype(jnp.bfloat16), z_src.astype(jnp.bfloat16),
                    preferred_element_type=jnp.float32)                # (TM, F)
        outs.append(_elu(s * scale))

    out_ref[...] = jnp.concatenate(outs, axis=-1)                      # (TM, H*F)


def gat_forward(a_w, x, w0, b0, w1, attn_l, attn_r, *, tm=None,
                vmem_limit_bytes=48 * 1024 * 1024):
    n, din = x.shape
    num_heads, hd, f = w1.shape
    if tm is None:
        # Biggest dst-row tile whose double-buffered (tm, N) bf16 adjacency tiles plus
        # the per-head (tm, N) f32 score temporaries stay inside scoped VMEM.
        # 256 is sized for v7x's 64 MiB; v5e/v6e (128 MiB) could go larger.
        tm = n if n <= 256 else 256
    assert n % tm == 0, "N must be divisible by the row-tile size"
    grid = (n // tm,)

    a_w16 = a_w.astype(jnp.bfloat16)   # bf16 MXU operand; halves HBM traffic of the O(N^2) array
    x16 = x.astype(jnp.bfloat16)
    w1_flat = jnp.transpose(w1, (1, 0, 2)).reshape(hd, num_heads * f)

    cparams = pltpu.CompilerParams(
        dimension_semantics=("parallel",),      # independent row tiles -> both TCs on v7x
        vmem_limit_bytes=vmem_limit_bytes,
    )

    # Pass 1: z = ELU(a_w @ x @ w0 + b0) @ w1_flat, tiled over dst rows.
    z = pl.pallas_call(
        _proj_kernel,
        out_shape=jax.ShapeDtypeStruct((n, num_heads * f), jnp.float32),
        grid=grid,
        in_specs=[
            pl.BlockSpec((tm, n), lambda i: (i, 0)),
            pl.BlockSpec((n, din), lambda i: (0, 0)),
            pl.BlockSpec((din, hd), lambda i: (0, 0)),
            pl.BlockSpec((1, hd), lambda i: (0, 0)),
            pl.BlockSpec((hd, num_heads * f), lambda i: (0, 0)),
        ],
        out_specs=pl.BlockSpec((tm, num_heads * f), lambda i: (i, 0)),
        compiler_params=cparams,
    )(a_w16, x16, w0, b0, w1_flat)

    # Pass 2: per-head edge-softmax attention; z stays VMEM-resident (constant block index).
    out_hf = pl.pallas_call(
        _attn_kernel,
        out_shape=jax.ShapeDtypeStruct((n, num_heads * f), jnp.float32),
        grid=grid,
        in_specs=[
            pl.BlockSpec((tm, n), lambda i: (i, 0)),
            pl.BlockSpec((n, num_heads * f), lambda i: (0, 0)),
            pl.BlockSpec((num_heads, 1, f), lambda i: (0, 0, 0)),
            pl.BlockSpec((num_heads, 1, f), lambda i: (0, 0, 0)),
        ],
        out_specs=pl.BlockSpec((tm, num_heads * f), lambda i: (i, 0)),
        compiler_params=cparams,
    )(a_w16, z, attn_l, attn_r)

    # Head-mean outside the kernel so the kernel store stays lane-dense at width H*F.
    return out_hf.reshape(n, num_heads, f).mean(axis=1)


def gat_reference(a_w, x, w0, b0, w1, attn_l, attn_r):
    """Pure-JAX f32 reference mirroring DGL GraphConv(norm='none') + GATConv semantics."""
    h0 = jax.nn.elu(a_w @ x @ w0 + b0)
    mask = a_w > 0
    num_heads = w1.shape[0]
    outs = []
    for h in range(num_heads):
        z_h = h0 @ w1[h]                                       # (N, F)
        el = z_h @ attn_l[h, 0]                                # (N,)
        er = z_h @ attn_r[h, 0]                                # (N,)
        e = jax.nn.leaky_relu(er[:, None] + el[None, :], NEG_SLOPE)
        e = jnp.where(mask, e, NEG_INF)
        alpha = jax.nn.softmax(e, axis=-1)
        alpha = jnp.where(mask, alpha, 0.0)
        outs.append(jax.nn.elu(alpha @ z_h))
    return jnp.mean(jnp.stack(outs, axis=1), axis=1)


if __name__ == "__main__":
    # Small, TPU-friendly synthetic problem.
    N = 16            # number of graph nodes
    IN_DIM = 8        # in_dim
    NUM_HIDDEN = 16   # num_hidden
    NUM_CLASSES = 8   # num_classes (= per-head out feats)
    NUM_HEADS = 4     # heads[0]

    key = jax.random.PRNGKey(0)
    k = jax.random.split(key, 8)

    # Graph: random edges + self loops, positive edge weights.
    mask = (jax.random.uniform(k[0], (N, N)) < 0.4).astype(jnp.float32)
    a_mask = jnp.maximum(mask, jnp.eye(N, dtype=jnp.float32))
    edge_w = jax.random.uniform(k[1], (N, N), minval=0.5, maxval=1.5)
    a_w = a_mask * edge_w

    # Node features.
    x = jax.random.normal(k[2], (N, IN_DIM), dtype=jnp.float32)

    # Deterministic synthetic parameters.
    w0 = 0.3 * jax.random.normal(k[3], (IN_DIM, NUM_HIDDEN), dtype=jnp.float32)
    b0 = 0.1 * jax.random.normal(k[4], (1, NUM_HIDDEN), dtype=jnp.float32)
    w1 = 0.3 * jax.random.normal(k[5], (NUM_HEADS, NUM_HIDDEN, NUM_CLASSES), dtype=jnp.float32)
    attn_l = 0.3 * jax.random.normal(k[6], (NUM_HEADS, 1, NUM_CLASSES), dtype=jnp.float32)
    attn_r = 0.3 * jax.random.normal(k[7], (NUM_HEADS, 1, NUM_CLASSES), dtype=jnp.float32)

    out = jax.block_until_ready(gat_forward(a_w, x, w0, b0, w1, attn_l, attn_r))
    ref = gat_reference(a_w, x, w0, b0, w1, attn_l, attn_r)

    assert out.shape == (N, NUM_CLASSES)
    max_err = jnp.max(jnp.abs(out - ref))
    # bf16 MXU operands (a_w, x, alpha, z) with f32 accumulation -> relaxed tolerance.
    assert jnp.allclose(out, ref, rtol=5e-2, atol=5e-2), f"max abs err {max_err}"
    print("KERNEL_OK")
</pallas_src>

<mosaic_0001>
module attributes {stable_mosaic.version = 11 : i64} {
  func.func @_proj_kernel(%arg0: i32, %arg1: memref<16x16xbf16, #tpu.memory_space<vmem>>, %arg2: memref<16x8xbf16, #tpu.memory_space<vmem>>, %arg3: memref<8x16xf32, #tpu.memory_space<vmem>>, %arg4: memref<1x16xf32, #tpu.memory_space<vmem>>, %arg5: memref<16x32xf32, #tpu.memory_space<vmem>>, %arg6: memref<16x32xf32, #tpu.memory_space<vmem>>) attributes {dimension_semantics = [#tpu.dimension_semantics<parallel>], iteration_bounds = array<i64: 1>, scalar_prefetch = 0 : i64, scratch_operands = 0 : i64, tpu.core_type = #tpu.core_type<tc>, window_params = [{transform_indices = @transform_0, window_bounds = array<i64: 16, 16>}, {pipeline_mode = #tpu.pipeline_mode<synchronous>, transform_indices = @transform_1, window_bounds = array<i64: 16, 8>}, {pipeline_mode = #tpu.pipeline_mode<synchronous>, transform_indices = @transform_2, window_bounds = array<i64: 8, 16>}, {pipeline_mode = #tpu.pipeline_mode<synchronous>, transform_indices = @transform_3, window_bounds = array<i64: 1, 16>}, {pipeline_mode = #tpu.pipeline_mode<synchronous>, transform_indices = @transform_4, window_bounds = array<i64: 16, 32>}, {transform_indices = @transform_5, window_bounds = array<i64: 16, 32>}]} {
    %c0 = arith.constant 0 : index
    %c0_0 = arith.constant 0 : index
    %0 = vector.load %arg1[%c0, %c0_0] : memref<16x16xbf16, #tpu.memory_space<vmem>>, vector<16x16xbf16>
    %c0_1 = arith.constant 0 : index
    %c0_2 = arith.constant 0 : index
    %1 = vector.load %arg2[%c0_1, %c0_2] : memref<16x8xbf16, #tpu.memory_space<vmem>>, vector<16x8xbf16>
    %cst = arith.constant dense<0.000000e+00> : vector<16x8xf32>
    %2 = tpu.matmul %0, %1, %cst {dimension_numbers = #tpu.dot_dimension_numbers<[1], [0], [0], [1], [0, 0, 1, 1], [], []>} : vector<16x16xbf16>, vector<16x8xbf16>, vector<16x8xf32> -> vector<16x8xf32>
    %c0_3 = arith.constant 0 : index
    %c0_4 = arith.constant 0 : index
    %3 = vector.load %arg3[%c0_3, %c0_4] : memref<8x16xf32, #tpu.memory_space<vmem>>, vector<8x16xf32>
    %cst_5 = arith.constant dense<0.000000e+00> : vector<16x16xf32>
    %4 = tpu.matmul %2, %3, %cst_5 {dimension_numbers = #tpu.dot_dimension_numbers<[1], [0], [0], [1], [0, 0, 1, 1], [], []>} : vector<16x8xf32>, vector<8x16xf32>, vector<16x16xf32> -> vector<16x16xf32>
    %c0_6 = arith.constant 0 : index
    %c0_7 = arith.constant 0 : index
    %5 = vector.load %arg4[%c0_6, %c0_7] : memref<1x16xf32, #tpu.memory_space<vmem>>, vector<1x16xf32>
    %6 = vector.broadcast %5 : vector<1x16xf32> to vector<16x16xf32>
    %7 = arith.addf %4, %6 : vector<16x16xf32>
    %cst_8 = arith.constant 0.000000e+00 : f32
    %8 = vector.broadcast %cst_8 : f32 to vector<16x16xf32>
    %9 = arith.cmpf ogt, %7, %8 : vector<16x16xf32>
    %10 = math.exp %7 : vector<16x16xf32>
    %cst_9 = arith.constant 1.000000e+00 : f32
    %11 = vector.broadcast %cst_9 : f32 to vector<16x16xf32>
    %12 = arith.subf %10, %11 : vector<16x16xf32>
    %13 = arith.select %9, %7, %12 : vector<16x16xi1>, vector<16x16xf32>
    %c0_10 = arith.constant 0 : index
    %c0_11 = arith.constant 0 : index
    %14 = vector.load %arg5[%c0_10, %c0_11] : memref<16x32xf32, #tpu.memory_space<vmem>>, vector<16x32xf32>
    %cst_12 = arith.constant dense<0.000000e+00> : vector<16x32xf32>
    %15 = tpu.matmul %13, %14, %cst_12 {dimension_numbers = #tpu.dot_dimension_numbers<[1], [0], [0], [1], [0, 0, 1, 1], [], []>} : vector<16x16xf32>, vector<16x32xf32>, vector<16x32xf32> -> vector<16x32xf32>
    %c0_13 = arith.constant 0 : index
    %c0_14 = arith.constant 0 : index
    %16 = vector.load %arg6[%c0_13, %c0_14] : memref<16x32xf32, #tpu.memory_space<vmem>>, vector<16x32xf32>
    tpu.vector_store %arg6[%c0_13, %c0_14], %15 {strides = array<i32>} : memref<16x32xf32, #tpu.memory_space<vmem>>, vector<16x32xf32>,
    return
  }
  func.func @transform_0(%arg0: i32) -> (i32, i32) {
    %c0_i32 = arith.constant 0 : i32
    %c0_i32_0 = arith.constant 0 : i32
    return %arg0, %c0_i32 : i32, i32
  }
  func.func @transform_1(%arg0: i32) -> (i32, i32) {
    %c0_i32 = arith.constant 0 : i32
    %c0_i32_0 = arith.constant 0 : i32
    %c0_i32_1 = arith.constant 0 : i32
    return %c0_i32, %c0_i32_0 : i32, i32
  }
  func.func @transform_2(%arg0: i32) -> (i32, i32) {
    %c0_i32 = arith.constant 0 : i32
    %c0_i32_0 = arith.constant 0 : i32
    %c0_i32_1 = arith.constant 0 : i32
    return %c0_i32, %c0_i32_0 : i32, i32
  }
  func.func @transform_3(%arg0: i32) -> (i32, i32) {
    %c0_i32 = arith.constant 0 : i32
    %c0_i32_0 = arith.constant 0 : i32
    %c0_i32_1 = arith.constant 0 : i32
    return %c0_i32, %c0_i32_0 : i32, i32
  }
  func.func @transform_4(%arg0: i32) -> (i32, i32) {
    %c0_i32 = arith.constant 0 : i32
    %c0_i32_0 = arith.constant 0 : i32
    %c0_i32_1 = arith.constant 0 : i32
    return %c0_i32, %c0_i32_0 : i32, i32
  }
  func.func @transform_5(%arg0: i32) -> (i32, i32) {
    %c0_i32 = arith.constant 0 : i32
    %c0_i32_0 = arith.constant 0 : i32
    return %arg0, %c0_i32 : i32, i32
  }
}

</mosaic_0001>

<bundles_post_ra>
// kernel: tpu_custom_call.1
= control target key start
LH: loop header
LB: loop body
LE: loop exit
PB: predicated region body
PF: predicated region fallthrough
CT: control target
= control target key end

     0   :  { %10 = vsyncpa [#allocation3], 0  ;;  %s476_s0 = inlined_call_operand.vmem [shape: bf16[16,16], index: 0, kind: input, shape index: {}]   ;;  %s477_s1 = inlined_call_operand.vmem [shape: bf16[16,8], index: 1, kind: input, shape index: {}]   ;;  %s478_s2 = inlined_call_operand.hbm [shape: f32[8,16], index: 2, kind: input, shape index: {}]   ;;  %s479_s3 = inlined_call_operand.vmem [shape: f32[1,16], index: 3, kind: input, shape index: {}]   ;;  %s480_s4 = inlined_call_operand.vmem [shape: f32[16,32], index: 4, kind: input, shape index: {}]   ;;  %s481_s5 = inlined_call_operand.hbm [shape: f32[16,32], index: 5, kind: output, shape index: {}]  }
   0x1   :  { %11 = vsyncpa [#allocation4], 0  ;;  %s398_s18 = smov [#allocation2]   ;;  %s350_s22 = scalar_lea.hbm %s478_s2, 128 }
   0x2   :  { %s22_s19 = sshll.u32 %s398_s18, 4  ;;  %p351_p0 = scmp.ne.s32.totalorder %s478_s2, %s350_s22  ;;  %s23_s19 = int_to_ptr.vmem [resolvable:$true] %s22_s19 }
   0x3   :  { %p354_p1 = scmp.lt.u32.totalorder %s350_s22, %s478_s2 }
   0x5   :  { %p356_p2 = pnand %p354_p1, %p351_p0 }
   0x7   :  { %359 = shalt.err (!%p356_p2)
}
   0x8   :  { %s360_s27 = scalar_lea.vmem %s23_s19, 128  ;;  %p365_p4 = scmp.lt.s32.totalorder %s23_s19, %s23_s19 }
   0x9   :  { %p361_p3 = scmp.ne.s32.totalorder %s23_s19, %s360_s27  ;;  %p366_p5 = scmp.lt.s32.totalorder %s360_s27, %s360_s27 }
   0xb   :  { %p367_p6 = por %p366_p5, %p365_p4 }
   0xd   :  { %p368_p7 = pnand %p367_p6, %p361_p3 }
   0xf   :  { %371 = shalt.err (!%p368_p7)
}
  0x10   :  { %25 = dma.hbm_to_vmem [thread:$0]  %s478_s2, 128, %s23_s19, [#allocation3]  }
  0x11   :  { %394 = dma.done.wait [#allocation3], 128  }
  0x12   :  { %395 = vsyncadd [#allocation3], 4294967168  ;;  %v399_v0 = vmov 0.0   ;;  %vm400_vm0 = vmmov 0   ;;  %v344_v1 = vld [vmem:[%s477_s1] sm:$0xff]   ;;  %vm49_vm1 = vcmask 130048  }
  0x13   :  { %316 = vmatprep.subr.bf16.mxu0 %v399_v0  ;;  %318 = vmatprep.mubr.msk.bf16.mxu0 %vm400_vm0, %v399_v0  ;;  %v345_v2 = vld [vmem:[%s476_s0] sm:$0xff]   ;;  %vm102_vm2 = vcmask 64512   ;;  %v195_v9 = vld [vmem:[%s480_s4 + $0x8] sm:$0xff]  ;;  %vm277_vm5 = vcmask 261120  }
  0x14   :  { %317 = vmatpush3.bf16.msra.mxu0 %v344_v1  ;;  %v94_v3 = vld [vmem:[#allocation2] sm:$0xff] }
  0x15   :  { %322 = vmatprep.subr.mxu1 %v94_v3  ;;  %v194_v8 = vld [vmem:[%s480_s4] sm:$0xff] }
  0x16   :  { %323 = vmatpush3.msra.mxu1 %v94_v3  ;;  %v334_v10 = vpack.c.bf16 %v195_v9, %v194_v8  ;;  %v300_v11 = vld [vmem:[%s479_s3] ss:$0 sm:$0xff]  ;;  %s401_s3 = smov [#allocation5]  }
  0x17   :  { %319 = vmatmul.mubr.msk.bf16.vlgmr.msra.gmra.mrb[0].mxu0 %vm49_vm1, %v345_v2  ;;  %s285_s4 = sshll.u32 %s401_s3, 4  ;;  %s286_s4 = int_to_ptr.vmem [resolvable:$true] %s285_s4 }
  0x18   :  { %335 = vmatprep.subr.bf16.mxu1 %v334_v10  ;;  %s372_s12 = scalar_lea.vmem %s286_s4, 256  ;;  %p377_p9 = scmp.lt.s32.totalorder %s286_s4, %s286_s4 }
  0x19   :  { %p373_p8 = scmp.ne.s32.totalorder %s286_s4, %s372_s12  ;;  %p378_p10 = scmp.lt.s32.totalorder %s372_s12, %s372_s12 }
  0x1b   :  { %p379_p11 = por %p378_p10, %p377_p9 }
  0x1d   :  { %p380_p12 = pnand %p379_p11, %p373_p8 }
  0xea   :  { %v87_v4 = vpop.f32.mrb[0].mxu0 }
  0xeb   :  { %v320_v5 = vpop.f32.mrb[1].mxu0  ;;  %324 = vmatprep.mubr.msk.f32.mxu1 %vm102_vm2, %v87_v4 }
  0xec   :  { %v90_v6 = vpop.f32.mrb[2].mxu0 }
  0xed   :  { %v321_v7 = vpop.f32.mrb[3].mxu0  ;;  %325 = vmatmul.mubr.msk.f32.vlgmr.msra.gmra.mrb[0].mxu1 %vm102_vm2, %v90_v6 }
  0xee   :  { %337 = vmatpush3.bf16.msra.mxu1 %v334_v10 }
 0x1c0   :  { %v326_v12 = vpop.f32.mrb[0].mxu1 }
 0x1c1   :  { %v181_v13 = vadd.f32 %v326_v12, %v300_v11  ;;  %v175_v14 = vpop.f32.mrb[1].mxu1 }
 0x1c2   :  { %v176_v15 = vadd.f32 %v300_v11, %v175_v14 }
 0x1c3   :  { %v188_v16 = vmul.f32 1.442695, %v181_v13  ;;  %vm185_vm4 = vcmp.gt.f32.partialorder %v181_v13, 0.0 }
 0x1c4   :  { %v186_v17 = vmul.f32 1.442695, %v176_v15  ;;  %vm184_vm3 = vcmp.gt.f32.partialorder %v176_v15, 0.0 }
 0x1c5   :  { %346 = vpow2.f32 %v188_v16 }
 0x1c6   :  { %348 = vpow2.f32 %v186_v17 }
 0x1cf   :  { %v347_v18 = vpop.eup %346 }
 0x1d0   :  { %v349_v19 = vpop.eup %348  ;;  %v304_v20 = vadd.f32 -1.0, %v347_v18 }
 0x1d1   :  { %v303_v21 = vadd.f32 -1.0, %v349_v19 }
 0x1d2   :  { %v193_v23 = vsel %vm185_vm4, %v181_v13, %v304_v20 }
 0x1d3   :  { %v192_v22 = vsel %vm184_vm3, %v176_v15, %v303_v21 }
 0x1d4   :  { %331 = vmatprep.mubr.msk.f32.mxu1 %vm49_vm1, %v192_v22 }
 0x1d5   :  { %332 = vmatmul.mubr.msk.f32.vlgmr.msra.gmra.mrb[2].mxu1 %vm49_vm1, %v193_v23 }
 0x2a8   :  { %v333_v24 = vpop.f32.mrb[2].mxu1 }
 0x2a9   :  { %279 = vst.msk [vmem:[#allocation5 + $0x8] sm:$0xff] %vm277_vm5, %v333_v24  ;;  %v268_v25 = vpop.f32.mrb[3].mxu1 }
 0x2aa   :  { %278 = vst.msk [vmem:[#allocation5] sm:$0xff] %vm277_vm5, %v268_v25 }
 0x2ab   :  { %383 = shalt.err (!%p380_p12)
}
 0x2ac   :  { %s384_s15 = scalar_lea.hbm %s481_s5, 256 }
 0x2ad   :  { %p385_p13 = scmp.ne.s32.totalorder %s481_s5, %s384_s15  ;;  %p388_p0 = scmp.lt.u32.totalorder %s384_s15, %s481_s5 }
 0x2af   :  { %p390_p1 = pnand %p388_p0, %p385_p13 }
 0x2b1   :  { %393 = shalt.err (!%p390_p1)
}
 0x2b2   :  { %s402_s20 = smov 128   ;;  %s403_s21 = smov 8  }
 0x2b3   :  { %291 = dma.vmem_to_hbm [thread:$0]  %s286_s4, 256, %s481_s5, [#allocation4], %s402_s20, %s402_s20, %s403_s21  }
 0x2b4   :  { %396 = dma.done.wait [#allocation4], 256  }
 0x2b5   :  { %397 = vsyncadd [#allocation4], 4294967040 }
 0x2b6   :  { %295 = vsyncpa [#allocation3], 1 }
 0x2b7   :  { %296 = vsyncpa [#allocation4], 1 }

</bundles_post_ra>
